<compile_context>
chip_gen: v5e
topology: v5e:2x2
jax: 0.10.0
libtpu: 0.0.40
codegen_flags: <defaults>
</compile_context>

<pallas_src>
import functools

import jax
import jax.numpy as jnp
from jax import lax
from jax.experimental import pallas as pl
from jax.experimental.pallas import tpu as pltpu


def _attn_kernel(x_ref, wq_ref, bq_ref, wk_ref, bk_ref, wv_ref, bv_ref,
                 wo_ref, bo_ref, bias_ref, o_ref, acc_ref, *, compute_dtype):
    # Grid = (batch, head).  Per step:
    #   x_ref:    (1, T, E)   activations for this batch element (compute_dtype)
    #   wq/wk/wv: (1, E, hd)  per-head projection weights (scaling folded into wq)
    #   bq/bk/bv: (1, 1, hd)  per-head biases (float32)
    #   wo_ref:   (1, hd, E)  per-head slice of the output projection
    #   bo_ref:   (1, E)      output-projection bias (float32)
    #   bias_ref: (1, T, S)   combined additive mask (attn_mask + key padding)
    #   o_ref:    (1, T, E)   output block (constant across the head axis)
    #   acc_ref:  (T, E) f32  VMEM accumulator across heads
    h = pl.program_id(1)

    @pl.when(h == 0)
    def _():
        acc_ref[...] = jnp.zeros_like(acc_ref)

    x = x_ref[0]                                                 # (T, E)

    # Per-head projections on the MXU (K = E), f32 accumulation.
    q = jnp.dot(x, wq_ref[0], preferred_element_type=jnp.float32) + bq_ref[0]
    k = jnp.dot(x, wk_ref[0], preferred_element_type=jnp.float32) + bk_ref[0]
    v = jnp.dot(x, wv_ref[0], preferred_element_type=jnp.float32) + bv_ref[0]

    # scores = q @ k^T without materializing a transpose: contract last dims.
    scores = lax.dot_general(
        q.astype(compute_dtype), k.astype(compute_dtype),
        dimension_numbers=(((1,), (1,)), ((), ())),
        preferred_element_type=jnp.float32)                      # (T, S)
    scores = scores + bias_ref[0]                                # one add, masks pre-combined

    # Softmax with EUP reciprocal (+ one Newton step on the tiny (T,1) vector).
    m = jnp.max(scores, axis=-1, keepdims=True)
    e = jnp.exp(scores - m)
    denom = jnp.sum(e, axis=-1, keepdims=True)
    r = pl.reciprocal(denom, approx=True)
    r = r * (2.0 - denom * r)
    p = e * r                                                    # (T, S)

    ctx = jnp.dot(p.astype(compute_dtype), v.astype(compute_dtype),
                  preferred_element_type=jnp.float32)            # (T, hd)

    # Accumulate this head's contribution to the output projection.
    acc_ref[...] += jnp.dot(ctx.astype(compute_dtype), wo_ref[0],
                            preferred_element_type=jnp.float32)  # (T, E)

    @pl.when(h == pl.num_programs(1) - 1)
    def _():
        o_ref[0] = (acc_ref[...] + bo_ref[...]).astype(o_ref.dtype)


def self_attention_pallas(query, params, key_padding_mask=None, attn_mask=None,
                          *, num_heads, compute_dtype=jnp.bfloat16):
    """query: (T, B, E) float32. key_padding_mask: (B, S) bool. attn_mask: (T, S)."""
    T, B, E = query.shape
    hd = E // num_heads
    S = T  # self-attention
    scaling = hd ** (-0.5)
    f32 = jnp.float32

    # TODO(synk): accepting/producing (B, T, E) at the call boundary would save
    # these two XLA transpose passes; kept to match the module's (T, B, E) API.
    x = jnp.transpose(query, (1, 0, 2)).astype(compute_dtype)    # (B, T, E)

    def per_head_in(w):      # (E_out, E_in) torch weight -> (H, E_in, hd)
        return jnp.transpose(w.T.reshape(E, num_heads, hd), (1, 0, 2))

    wq_h = (per_head_in(params["Wq"]) * scaling).astype(compute_dtype)
    wk_h = per_head_in(params["Wk"]).astype(compute_dtype)
    wv_h = per_head_in(params["Wv"]).astype(compute_dtype)
    wo_h = params["Wo"].T.reshape(num_heads, hd, E).astype(compute_dtype)

    bq_h = (params["bq"].reshape(num_heads, 1, hd) * scaling).astype(f32)
    bk_h = params["bk"].reshape(num_heads, 1, hd).astype(f32)
    bv_h = params["bv"].reshape(num_heads, 1, hd).astype(f32)
    bo = params["bo"].reshape(1, E).astype(f32)

    # Pre-combine masks once on the host into a single additive bias.
    am = (jnp.zeros((T, S), f32) if attn_mask is None
          else attn_mask.astype(f32).reshape(T, S))
    if key_padding_mask is None:
        kb = jnp.zeros((B, 1, S), f32)
    else:
        kb = jnp.where(key_padding_mask.reshape(B, 1, S),
                       jnp.float32(-1e9), jnp.float32(0.0))
    bias = jnp.broadcast_to(am[None, :, :] + kb, (B, T, S))

    kernel = functools.partial(_attn_kernel, compute_dtype=compute_dtype)

    out = pl.pallas_call(
        kernel,
        out_shape=jax.ShapeDtypeStruct((B, T, E), query.dtype),
        grid_spec=pltpu.PrefetchScalarGridSpec(
            num_scalar_prefetch=0,
            grid=(B, num_heads),
            in_specs=[
                pl.BlockSpec((1, T, E), lambda b, h: (b, 0, 0)),    # x
                pl.BlockSpec((1, E, hd), lambda b, h: (h, 0, 0)),   # wq (per head)
                pl.BlockSpec((1, 1, hd), lambda b, h: (h, 0, 0)),   # bq
                pl.BlockSpec((1, E, hd), lambda b, h: (h, 0, 0)),   # wk
                pl.BlockSpec((1, 1, hd), lambda b, h: (h, 0, 0)),   # bk
                pl.BlockSpec((1, E, hd), lambda b, h: (h, 0, 0)),   # wv
                pl.BlockSpec((1, 1, hd), lambda b, h: (h, 0, 0)),   # bv
                pl.BlockSpec((1, hd, E), lambda b, h: (h, 0, 0)),   # wo (per head)
                pl.BlockSpec((1, E), lambda b, h: (0, 0)),          # bo
                pl.BlockSpec((1, T, S), lambda b, h: (b, 0, 0)),    # combined mask
            ],
            out_specs=pl.BlockSpec((1, T, E), lambda b, h: (b, 0, 0)),
            scratch_shapes=[pltpu.VMEM((T, E), jnp.float32)],
        ),
        compiler_params=pltpu.CompilerParams(
            dimension_semantics=("parallel", "arbitrary")),
    )(x, wq_h, bq_h, wk_h, bk_h, wv_h, bv_h, wo_h, bo, bias)

    return jnp.transpose(out, (1, 0, 2))                           # back to (T, B, E)


def self_attention_ref(query, params, key_padding_mask, attn_mask, *, num_heads):
    """Pure-JAX reference mirroring the PyTorch forward."""
    T, B, E = query.shape
    hd = E // num_heads
    scaling = hd ** (-0.5)
    q = (query @ params["Wq"].T + params["bq"]) * scaling
    k = query @ params["Wk"].T + params["bk"]
    v = query @ params["Wv"].T + params["bv"]

    def shape(t):  # (T, B, E) -> (B*H, T, hd), matches torch _shape
        return t.reshape(T, B * num_heads, hd).transpose(1, 0, 2)

    q, k, v = shape(q), shape(k), shape(v)
    w = jnp.einsum("btd,bsd->bts", q, k)                 # (B*H, T, S)
    if attn_mask is not None:
        w = (w.reshape(B, num_heads, T, T) + attn_mask).reshape(B * num_heads, T, T)
    if key_padding_mask is not None:
        w = w.reshape(B, num_heads, T, T)
        w = jnp.where(key_padding_mask[:, None, None, :], -jnp.inf, w)
        w = w.reshape(B * num_heads, T, T)
    w = jax.nn.softmax(w, axis=-1)
    o = jnp.einsum("bts,bsd->btd", w, v)                 # (B*H, T, hd)
    o = o.transpose(1, 0, 2).reshape(T, B, E)
    return o @ params["Wo"].T + params["bo"]


if __name__ == "__main__":
    T, B, E, H = 8, 2, 32, 4

    key = jax.random.PRNGKey(0)
    ks = jax.random.split(key, 10)
    scale = 0.1
    params = {
        "Wq": scale * jax.random.normal(ks[0], (E, E), jnp.float32),
        "bq": scale * jax.random.normal(ks[1], (E,), jnp.float32),
        "Wk": scale * jax.random.normal(ks[2], (E, E), jnp.float32),
        "bk": scale * jax.random.normal(ks[3], (E,), jnp.float32),
        "Wv": scale * jax.random.normal(ks[4], (E, E), jnp.float32),
        "bv": scale * jax.random.normal(ks[5], (E,), jnp.float32),
        "Wo": scale * jax.random.normal(ks[6], (E, E), jnp.float32),
        "bo": scale * jax.random.normal(ks[7], (E,), jnp.float32),
    }
    query = jax.random.normal(ks[8], (T, B, E), jnp.float32)
    # pad the last two key positions of batch 1
    key_padding_mask = jnp.zeros((B, T), dtype=bool).at[1, -2:].set(True)
    attn_mask = jnp.zeros((T, T), dtype=jnp.float32)

    ref = self_attention_ref(query, params, key_padding_mask, attn_mask,
                             num_heads=H)

    # f32 MXU-input path: tight numerical check.
    out_f32 = self_attention_pallas(query, params, key_padding_mask, attn_mask,
                                    num_heads=H, compute_dtype=jnp.float32)
    out_f32 = jax.block_until_ready(out_f32)
    assert out_f32.shape == (T, B, E)
    assert jnp.allclose(out_f32, ref, atol=1e-4, rtol=1e-4), \
        f"f32 max abs err {jnp.max(jnp.abs(out_f32 - ref))}"

    # bf16 MXU-input / f32-accumulate path (production recipe): loose check.
    out_bf16 = self_attention_pallas(query, params, key_padding_mask, attn_mask,
                                     num_heads=H, compute_dtype=jnp.bfloat16)
    out_bf16 = jax.block_until_ready(out_bf16)
    assert out_bf16.shape == (T, B, E)
    assert jnp.allclose(out_bf16, ref, atol=3e-2, rtol=3e-2), \
        f"bf16 max abs err {jnp.max(jnp.abs(out_bf16 - ref))}"

    print("KERNEL_OK")
</pallas_src>

<mosaic_0001>
module attributes {stable_mosaic.version = 11 : i64} {
  func.func @_attn_kernel(%arg0: i32, %arg1: i32, %arg2: memref<1x8x32xf32, #tpu.memory_space<vmem>>, %arg3: memref<1x32x8xf32, #tpu.memory_space<vmem>>, %arg4: memref<1x1x8xf32, #tpu.memory_space<vmem>>, %arg5: memref<1x32x8xf32, #tpu.memory_space<vmem>>, %arg6: memref<1x1x8xf32, #tpu.memory_space<vmem>>, %arg7: memref<1x32x8xf32, #tpu.memory_space<vmem>>, %arg8: memref<1x1x8xf32, #tpu.memory_space<vmem>>, %arg9: memref<1x8x32xf32, #tpu.memory_space<vmem>>, %arg10: memref<1x32xf32, #tpu.memory_space<vmem>>, %arg11: memref<1x8x8xf32, #tpu.memory_space<vmem>>, %arg12: memref<1x8x32xf32, #tpu.memory_space<vmem>>, %arg13: memref<8x32xf32, #tpu.memory_space<vmem>>) attributes {dimension_semantics = [#tpu.dimension_semantics<parallel>, #tpu.dimension_semantics<arbitrary>], iteration_bounds = array<i64: 2, 4>, scalar_prefetch = 0 : i64, scratch_operands = 1 : i64, tpu.core_type = #tpu.core_type<tc>, window_params = [{transform_indices = @transform_0, window_bounds = array<i64: 1, 8, 32>}, {transform_indices = @transform_1, window_bounds = array<i64: 1, 32, 8>}, {transform_indices = @transform_2, window_bounds = array<i64: 1, 1, 8>}, {transform_indices = @transform_3, window_bounds = array<i64: 1, 32, 8>}, {transform_indices = @transform_4, window_bounds = array<i64: 1, 1, 8>}, {transform_indices = @transform_5, window_bounds = array<i64: 1, 32, 8>}, {transform_indices = @transform_6, window_bounds = array<i64: 1, 1, 8>}, {transform_indices = @transform_7, window_bounds = array<i64: 1, 8, 32>}, {pipeline_mode = #tpu.pipeline_mode<synchronous>, transform_indices = @transform_8, window_bounds = array<i64: 1, 32>}, {transform_indices = @transform_9, window_bounds = array<i64: 1, 8, 8>}, {transform_indices = @transform_10, window_bounds = array<i64: 1, 8, 32>}]} {
    %c0_i32 = arith.constant 0 : i32
    %0 = arith.cmpi eq, %arg1, %c0_i32 : i32
    %1 = arith.extui %0 : i1 to i32
    %c0_i32_0 = arith.constant 0 : i32
    %2 = arith.cmpi ne, %1, %c0_i32_0 : i32
    scf.if %2 {
      %cst_40 = arith.constant 0.000000e+00 : f32
      %54 = vector.broadcast %cst_40 : f32 to vector<8x32xf32>
      %c0_41 = arith.constant 0 : index
      %c0_42 = arith.constant 0 : index
      %55 = vector.load %arg13[%c0_41, %c0_42] : memref<8x32xf32, #tpu.memory_space<vmem>>, vector<8x32xf32>
      tpu.vector_store %arg13[%c0_41, %c0_42], %54 {strides = array<i32>} : memref<8x32xf32, #tpu.memory_space<vmem>>, vector<8x32xf32>,
    } else {
    }
    %c0 = arith.constant 0 : index
    %c0_1 = arith.constant 0 : index
    %c0_2 = arith.constant 0 : index
    %3 = vector.load %arg2[%c0, %c0_1, %c0_2] : memref<1x8x32xf32, #tpu.memory_space<vmem>>, vector<1x8x32xf32>
    %4 = vector.shape_cast %3 : vector<1x8x32xf32> to vector<8x32xf32>
    %c0_3 = arith.constant 0 : index
    %c0_4 = arith.constant 0 : index
    %c0_5 = arith.constant 0 : index
    %5 = vector.load %arg3[%c0_3, %c0_4, %c0_5] : memref<1x32x8xf32, #tpu.memory_space<vmem>>, vector<1x32x8xf32>
    %6 = vector.shape_cast %5 : vector<1x32x8xf32> to vector<32x8xf32>
    %cst = arith.constant dense<0.000000e+00> : vector<8x8xf32>
    %7 = tpu.matmul %4, %6, %cst {dimension_numbers = #tpu.dot_dimension_numbers<[1], [0], [0], [1], [0, 0, 1, 1], [], []>} : vector<8x32xf32>, vector<32x8xf32>, vector<8x8xf32> -> vector<8x8xf32>
    %c0_6 = arith.constant 0 : index
    %c0_7 = arith.constant 0 : index
    %c0_8 = arith.constant 0 : index
    %8 = vector.load %arg4[%c0_6, %c0_7, %c0_8] : memref<1x1x8xf32, #tpu.memory_space<vmem>>, vector<1x1x8xf32>
    %9 = vector.shape_cast %8 : vector<1x1x8xf32> to vector<1x8xf32>
    %10 = vector.broadcast %9 : vector<1x8xf32> to vector<8x8xf32>
    %11 = arith.addf %7, %10 : vector<8x8xf32>
    %c0_9 = arith.constant 0 : index
    %c0_10 = arith.constant 0 : index
    %c0_11 = arith.constant 0 : index
    %12 = vector.load %arg5[%c0_9, %c0_10, %c0_11] : memref<1x32x8xf32, #tpu.memory_space<vmem>>, vector<1x32x8xf32>
    %13 = vector.shape_cast %12 : vector<1x32x8xf32> to vector<32x8xf32>
    %cst_12 = arith.constant dense<0.000000e+00> : vector<8x8xf32>
    %14 = tpu.matmul %4, %13, %cst_12 {dimension_numbers = #tpu.dot_dimension_numbers<[1], [0], [0], [1], [0, 0, 1, 1], [], []>} : vector<8x32xf32>, vector<32x8xf32>, vector<8x8xf32> -> vector<8x8xf32>
    %c0_13 = arith.constant 0 : index
    %c0_14 = arith.constant 0 : index
    %c0_15 = arith.constant 0 : index
    %15 = vector.load %arg6[%c0_13, %c0_14, %c0_15] : memref<1x1x8xf32, #tpu.memory_space<vmem>>, vector<1x1x8xf32>
    %16 = vector.shape_cast %15 : vector<1x1x8xf32> to vector<1x8xf32>
    %17 = vector.broadcast %16 : vector<1x8xf32> to vector<8x8xf32>
    %18 = arith.addf %14, %17 : vector<8x8xf32>
    %c0_16 = arith.constant 0 : index
    %c0_17 = arith.constant 0 : index
    %c0_18 = arith.constant 0 : index
    %19 = vector.load %arg7[%c0_16, %c0_17, %c0_18] : memref<1x32x8xf32, #tpu.memory_space<vmem>>, vector<1x32x8xf32>
    %20 = vector.shape_cast %19 : vector<1x32x8xf32> to vector<32x8xf32>
    %cst_19 = arith.constant dense<0.000000e+00> : vector<8x8xf32>
    %21 = tpu.matmul %4, %20, %cst_19 {dimension_numbers = #tpu.dot_dimension_numbers<[1], [0], [0], [1], [0, 0, 1, 1], [], []>} : vector<8x32xf32>, vector<32x8xf32>, vector<8x8xf32> -> vector<8x8xf32>
    %c0_20 = arith.constant 0 : index
    %c0_21 = arith.constant 0 : index
    %c0_22 = arith.constant 0 : index
    %22 = vector.load %arg8[%c0_20, %c0_21, %c0_22] : memref<1x1x8xf32, #tpu.memory_space<vmem>>, vector<1x1x8xf32>
    %23 = vector.shape_cast %22 : vector<1x1x8xf32> to vector<1x8xf32>
    %24 = vector.broadcast %23 : vector<1x8xf32> to vector<8x8xf32>
    %25 = arith.addf %21, %24 : vector<8x8xf32>
    %cst_23 = arith.constant dense<0.000000e+00> : vector<8x8xf32>
    %26 = tpu.matmul %11, %18, %cst_23 {dimension_numbers = #tpu.dot_dimension_numbers<[1], [1], [0], [0], [0, 0, 1, 0], [], []>} : vector<8x8xf32>, vector<8x8xf32>, vector<8x8xf32> -> vector<8x8xf32>
    %c0_24 = arith.constant 0 : index
    %c0_25 = arith.constant 0 : index
    %c0_26 = arith.constant 0 : index
    %27 = vector.load %arg11[%c0_24, %c0_25, %c0_26] : memref<1x8x8xf32, #tpu.memory_space<vmem>>, vector<1x8x8xf32>
    %28 = vector.shape_cast %27 : vector<1x8x8xf32> to vector<8x8xf32>
    %29 = arith.addf %26, %28 : vector<8x8xf32>
    %cst_27 = arith.constant dense<0xFF800000> : vector<8xf32>
    %30 = vector.multi_reduction <maximumf>, %29, %cst_27 [1] : vector<8x8xf32> to vector<8xf32>
    %31 = vector.shape_cast %30 : vector<8xf32> to vector<8x1xf32>
    %32 = vector.broadcast %31 : vector<8x1xf32> to vector<8x8xf32>
    %33 = arith.subf %29, %32 : vector<8x8xf32>
    %34 = math.exp %33 : vector<8x8xf32>
    %cst_28 = arith.constant dense<0.000000e+00> : vector<8xf32>
    %35 = vector.multi_reduction <add>, %34, %cst_28 [1] : vector<8x8xf32> to vector<8xf32>
    %36 = vector.shape_cast %35 : vector<8xf32> to vector<8x1xf32>
    %37 = tpu.reciprocal %36 {approx = true} : vector<8x1xf32> -> vector<8x1xf32>
    %38 = arith.mulf %36, %37 : vector<8x1xf32>
    %cst_29 = arith.constant 2.000000e+00 : f32
    %39 = vector.broadcast %cst_29 : f32 to vector<8x1xf32>
    %40 = arith.subf %39, %38 : vector<8x1xf32>
    %41 = arith.mulf %37, %40 : vector<8x1xf32>
    %42 = vector.broadcast %41 : vector<8x1xf32> to vector<8x8xf32>
    %43 = arith.mulf %34, %42 : vector<8x8xf32>
    %cst_30 = arith.constant dense<0.000000e+00> : vector<8x8xf32>
    %44 = tpu.matmul %43, %25, %cst_30 {dimension_numbers = #tpu.dot_dimension_numbers<[1], [0], [0], [1], [0, 0, 1, 1], [], []>} : vector<8x8xf32>, vector<8x8xf32>, vector<8x8xf32> -> vector<8x8xf32>
    %c0_31 = arith.constant 0 : index
    %c0_32 = arith.constant 0 : index
    %45 = vector.load %arg13[%c0_31, %c0_32] : memref<8x32xf32, #tpu.memory_space<vmem>>, vector<8x32xf32>
    %c0_33 = arith.constant 0 : index
    %c0_34 = arith.constant 0 : index
    %c0_35 = arith.constant 0 : index
    %46 = vector.load %arg9[%c0_33, %c0_34, %c0_35] : memref<1x8x32xf32, #tpu.memory_space<vmem>>, vector<1x8x32xf32>
    %47 = vector.shape_cast %46 : vector<1x8x32xf32> to vector<8x32xf32>
    %cst_36 = arith.constant dense<0.000000e+00> : vector<8x32xf32>
    %48 = tpu.matmul %44, %47, %cst_36 {dimension_numbers = #tpu.dot_dimension_numbers<[1], [0], [0], [1], [0, 0, 1, 1], [], []>} : vector<8x8xf32>, vector<8x32xf32>, vector<8x32xf32> -> vector<8x32xf32>
    %49 = arith.addf %45, %48 : vector<8x32xf32>
    %c0_37 = arith.constant 0 : index
    %c0_38 = arith.constant 0 : index
    %50 = vector.load %arg13[%c0_37, %c0_38] : memref<8x32xf32, #tpu.memory_space<vmem>>, vector<8x32xf32>
    tpu.vector_store %arg13[%c0_37, %c0_38], %49 {strides = array<i32>} : memref<8x32xf32, #tpu.memory_space<vmem>>, vector<8x32xf32>,
    %c3_i32 = arith.constant 3 : i32
    %51 = arith.cmpi eq, %arg1, %c3_i32 : i32
    %52 = arith.extui %51 : i1 to i32
    %c0_i32_39 = arith.constant 0 : i32
    %53 = arith.cmpi ne, %52, %c0_i32_39 : i32
    scf.if %53 {
      %c0_40 = arith.constant 0 : index
      %c0_41 = arith.constant 0 : index
      %54 = vector.load %arg13[%c0_40, %c0_41] : memref<8x32xf32, #tpu.memory_space<vmem>>, vector<8x32xf32>
      %c0_42 = arith.constant 0 : index
      %c0_43 = arith.constant 0 : index
      %55 = vector.load %arg10[%c0_42, %c0_43] : memref<1x32xf32, #tpu.memory_space<vmem>>, vector<1x32xf32>
      %56 = vector.broadcast %55 : vector<1x32xf32> to vector<8x32xf32>
      %57 = arith.addf %54, %56 : vector<8x32xf32>
      %c0_44 = arith.constant 0 : index
      %c0_45 = arith.constant 0 : index
      %c0_46 = arith.constant 0 : index
      %58 = vector.load %arg12[%c0_44, %c0_45, %c0_46] : memref<1x8x32xf32, #tpu.memory_space<vmem>>, vector<1x8x32xf32>
      %59 = vector.shape_cast %58 : vector<1x8x32xf32> to vector<8x32xf32>
      %60 = vector.shape_cast %57 : vector<8x32xf32> to vector<1x8x32xf32>
      tpu.vector_store %arg12[%c0_44, %c0_45, %c0_46], %60 {strides = array<i32>} : memref<1x8x32xf32, #tpu.memory_space<vmem>>, vector<1x8x32xf32>,
    } else {
    }
    return
  }
  func.func @transform_0(%arg0: i32, %arg1: i32) -> (i32, i32, i32) {
    %c0_i32 = arith.constant 0 : i32
    %c0_i32_0 = arith.constant 0 : i32
    %c0_i32_1 = arith.constant 0 : i32
    return %arg0, %c0_i32, %c0_i32_0 : i32, i32, i32
  }
  func.func @transform_1(%arg0: i32, %arg1: i32) -> (i32, i32, i32) {
    %c0_i32 = arith.constant 0 : i32
    %c0_i32_0 = arith.constant 0 : i32
    %c0_i32_1 = arith.constant 0 : i32
    return %arg1, %c0_i32, %c0_i32_0 : i32, i32, i32
  }
  func.func @transform_2(%arg0: i32, %arg1: i32) -> (i32, i32, i32) {
    %c0_i32 = arith.constant 0 : i32
    %c0_i32_0 = arith.constant 0 : i32
    %c0_i32_1 = arith.constant 0 : i32
    return %arg1, %c0_i32, %c0_i32_0 : i32, i32, i32
  }
  func.func @transform_3(%arg0: i32, %arg1: i32) -> (i32, i32, i32) {
    %c0_i32 = arith.constant 0 : i32
    %c0_i32_0 = arith.constant 0 : i32
    %c0_i32_1 = arith.constant 0 : i32
    return %arg1, %c0_i32, %c0_i32_0 : i32, i32, i32
  }
  func.func @transform_4(%arg0: i32, %arg1: i32) -> (i32, i32, i32) {
    %c0_i32 = arith.constant 0 : i32
    %c0_i32_0 = arith.constant 0 : i32
    %c0_i32_1 = arith.constant 0 : i32
    return %arg1, %c0_i32, %c0_i32_0 : i32, i32, i32
  }
  func.func @transform_5(%arg0: i32, %arg1: i32) -> (i32, i32, i32) {
    %c0_i32 = arith.constant 0 : i32
    %c0_i32_0 = arith.constant 0 : i32
    %c0_i32_1 = arith.constant 0 : i32
    return %arg1, %c0_i32, %c0_i32_0 : i32, i32, i32
  }
  func.func @transform_6(%arg0: i32, %arg1: i32) -> (i32, i32, i32) {
    %c0_i32 = arith.constant 0 : i32
    %c0_i32_0 = arith.constant 0 : i32
    %c0_i32_1 = arith.constant 0 : i32
    return %arg1, %c0_i32, %c0_i32_0 : i32, i32, i32
  }
  func.func @transform_7(%arg0: i32, %arg1: i32) -> (i32, i32, i32) {
    %c0_i32 = arith.constant 0 : i32
    %c0_i32_0 = arith.constant 0 : i32
    %c0_i32_1 = arith.constant 0 : i32
    return %arg1, %c0_i32, %c0_i32_0 : i32, i32, i32
  }
  func.func @transform_8(%arg0: i32, %arg1: i32) -> (i32, i32) {
    %c0_i32 = arith.constant 0 : i32
    %c0_i32_0 = arith.constant 0 : i32
    %c0_i32_1 = arith.constant 0 : i32
    return %c0_i32, %c0_i32_0 : i32, i32
  }
  func.func @transform_9(%arg0: i32, %arg1: i32) -> (i32, i32, i32) {
    %c0_i32 = arith.constant 0 : i32
    %c0_i32_0 = arith.constant 0 : i32
    %c0_i32_1 = arith.constant 0 : i32
    return %arg0, %c0_i32, %c0_i32_0 : i32, i32, i32
  }
  func.func @transform_10(%arg0: i32, %arg1: i32) -> (i32, i32, i32) {
    %c0_i32 = arith.constant 0 : i32
    %c0_i32_0 = arith.constant 0 : i32
    %c0_i32_1 = arith.constant 0 : i32
    return %arg0, %c0_i32, %c0_i32_0 : i32, i32, i32
  }
}

</mosaic_0001>

<bundles_post_ra>
// kernel: tpu_custom_call.1
= control target key start
LH: loop header
LB: loop body
LE: loop exit
PB: predicated region body
PF: predicated region fallthrough
CT: control target
= control target key end

     0   :  { %s1344_s0 = inlined_call_operand.vmem [shape: f32[2,8,32], index: 0, kind: input, shape index: {}]   ;;  %s1345_s1 = inlined_call_operand.vmem [shape: f32[4,32,8], index: 1, kind: input, shape index: {}]   ;;  %s1346_s2 = inlined_call_operand.vmem [shape: f32[4,1,8], index: 2, kind: input, shape index: {}]   ;;  %s1347_s3 = inlined_call_operand.vmem [shape: f32[4,32,8], index: 3, kind: input, shape index: {}]   ;;  %s1348_s4 = inlined_call_operand.vmem [shape: f32[4,1,8], index: 4, kind: input, shape index: {}]   ;;  %s1349_s5 = inlined_call_operand.vmem [shape: f32[4,32,8], index: 5, kind: input, shape index: {}]   ;;  %s1350_s6 = inlined_call_operand.vmem [shape: f32[4,1,8], index: 6, kind: input, shape index: {}]   ;;  %s1351_s7 = inlined_call_operand.vmem [shape: f32[4,8,32], index: 7, kind: input, shape index: {}]   ;;  %s1352_s8 = inlined_call_operand.vmem [shape: f32[1,32], index: 8, kind: input, shape index: {}]   ;;  %s1353_s9 = inlined_call_operand.vmem [shape: f32[2,8,8], index: 9, kind: input, shape index: {}]   ;;  %s1354_s10 = inlined_call_operand.hbm [shape: f32[2,8,32], index: 10, kind: output, shape index: {}]  }
   0x1   :  { %1369 = sst [smem:[#allocation18_spill]] %s1344_s0 }
   0x2   :  { %1370 = sst [smem:[#allocation19_spill]] %s1345_s1 }
   0x3   :  { %1371 = sst [smem:[#allocation20_spill]] %s1354_s10 }
   0x4   :  { %15 = vsyncpa [#allocation4], 0 }
   0x5   :  { %17 = vsyncpa [#allocation4 + $0x1], 0  ;;  %s1137_s13 = smov 0   ;;  %s1139_s14 = smov 0  }
   0x6   :  { %s1141_s15 = smov 0   ;;  %s1143_s16 = smov 0  }
   0x7   :  { %s1145_s17 = smov 0   ;;  %s1147_s18 = smov 0  }
   0x8   :  { %s1149_s19 = smov 0   ;;  %s1151_s20 = smov 0  }
   0x9 LB: > { %1372 = sst [smem:[#allocation6_spill]] %s1051_s13  ;;  %s874_s21 = sadd.s32 4294967295, %s1079_s20   ;;  %s1079_s20 = sphi %s1151_s20, %s23_s20   ;;  %s1075_s19 = sphi %s1149_s19, %s1404_s19   ;;  %s1071_s18 = sphi %s1147_s18, %s1403_s18   ;;  %s1067_s17 = sphi %s1145_s17, %s1402_s17   ;;  %s1063_s16 = sphi %s1143_s16, %s1401_s16   ;;  %s1059_s15 = sphi %s1141_s15, %s1400_s15   ;;  %s1055_s14 = sphi %s1139_s14, %s1399_s14   ;;  %s1051_s13 = sphi %s1137_s13, %s1398_s13  }
   0xa   : > { %1373 = sst [smem:[#allocation7_spill]] %s1055_s14  ;;  %s875_s22 = sadd.s32 4294967294, %s1079_s20  }
   0xb   : > { %1374 = sst [smem:[#allocation8_spill]] %s1059_s15  ;;  %s32_s23 = sadd.s32 1, %s1071_s18 }
   0xc   : > { %1375 = sst [smem:[#allocation9_spill]] %s1067_s17  ;;  %p33_p0 = scmp.ge.s32.totalorder %s32_s23, 4 }
   0xd   : > { %1376 = sst [smem:[#allocation10_spill]] %s1071_s18  ;;  %s35_s24 = sadd.s32 1, %s1075_s19 }
   0xe   : > { %1377 = sst [smem:[#allocation11_spill]] %s1075_s19  ;;  %p307_p1 = scmp.ne.s32.totalorder %s1059_s15, %s1055_s14 }
   0xf   : > { %1378 = sst [smem:[#allocation12_spill]] %s1079_s20  ;;  %p308_p2 = scmp.eq.s32.totalorder %s874_s21, 7 }
  0x10   : > { %s1406_s23 = smov (%p33_p0, %s32_s23), 0  ;;  %s1408_s24 = smov (!%p33_p0, %s35_s24), %s1075_s19 }
  0x11   : > { %1379 = sst [smem:[#allocation13_spill]] %s1406_s23  ;;  %p1186_p3 = por %p308_p2, %p307_p1 }
  0x12   : > { %p313_p4 = scmp.ne.s32.totalorder %s1055_s14, %s1051_s13  ;;  %p37_p5 = scmp.ge.s32.totalorder %s1408_s24, 2 }
  0x13   : > { %s1380_s25 = scalar_select %p1186_p3, 1, 0 }
  0x14   : > { %p314_p6 = scmp.eq.s32.totalorder %s875_s22, 7  ;;  %p878_p7 = scmp.ge.s32.totalorder %s1079_s20, 1 }
  0x15   : > { %1381 = sst [smem:[#allocation14_spill]] %s1380_s25  ;;  %p398_p8 = scmp.lt.s32.totalorder %s1079_s20, 9 }
  0x16   : > { %s1410_s24 = smov (%p37_p5, %s1408_s24), 0  ;;  %p1196_p9 = por %p314_p6, %p313_p4 }
  0x17   : > { %1382 = sst [smem:[#allocation15_spill]] %s1410_s24  ;;  %p399_p10 = pnand %p878_p7, %p398_p8 }
  0x18   : > { %s1383_s26 = scalar_select %p1196_p9, 1, 0 }
  0x19   : > { %s294_s27 = ssub.s32 %s1075_s19, %s1410_s24  ;;  %s297_s28 = sadd.s32 1, %s1059_s15 }
  0x1a   : > { %1384 = sst [smem:[#allocation16_spill]] %s1383_s26  ;;  %p295_p11 = scmp.eq.s32.totalorder %s294_s27, 0 }
  0x1b   : > { %402 = sbr.rel (%p399_p10) target bundleno = 872 (0x368), region = 60  ;;  %s1357_s30 = sand.u32 (!%p399_p10), 1, %s1055_s14  }
  0x1c   : > { %s1204_s29 = scalar_select %p295_p11, %s1059_s15, %s297_s28  }
  0x1d   : > { %p467_p12 = scmp.lt.s32.totalorder (!%p399_p10), %s1067_s17, 1  ;;  %s1210_s11 = sshll.u32 (!%p399_p10), %s1357_s30, 3 }
  0x1e   : > { %1385 = sst [smem:[#allocation17_spill]] %s1204_s29  ;;  %p471_p13 = scmp.lt.s32.totalorder (!%p399_p10), %s1063_s16, 3 }
  0x1f   : > { %s1386_s0 = sld [smem:[#allocation18_spill]] (!%p399_p10)  ;;  %p889_p0 = scmp.ne.s32.totalorder (!%p399_p10), %s1063_s16, 0 }
  0x20   : > { %s468_s12 = scalar_select %p467_p12, %s1067_s17, 1 }
  0x21   : > { %s1215_s21 = scalar_select %p471_p13, %s1063_s16, 3 }
  0x22   : > { %s880_s22 = sshll.u32 %s468_s12, 3  ;;  %s1387_s1 = sld [smem:[#allocation19_spill]] }
  0x23   : > { %s902_s23 = sshll.u32 %s1215_s21, 5  ;;  %s486_s14 = scalar_lea.vmem %s1348_s4, %s1215_s21 }
  0x24   : > { %s483_s10 = scalar_lea.vmem %s1347_s3, %s902_s23  ;;  %s494_s30 = scalar_lea.vmem %s1350_s6, %s1215_s21 }
  0x25   : > { %s1220_s24 = scalar_lea.vmem %s1386_s0, %s880_s22  ;;  %s1240_s0 = scalar_lea.vmem %s1349_s5, %s902_s23 }
  0x26   : > { %s1250_s26 = scalar_lea.vmem %s1353_s9, %s880_s22  ;;  %s466_s12 = scalar_lea.vmem [#allocation3], %s1210_s11 }
  0x27   : > { %506 = sbr.rel (%p889_p0) target bundleno = 46 (0x2e), region = 64 }
  0x28   : > { %s475_s18 = scalar_lea.vmem %s1387_s1, %s902_s23  ;;  %s887_s1 = sshll.u32 %s1215_s21, 3 }
  0x29   : > { %s1255_s25 = scalar_lea.vmem %s1351_s7, %s887_s1 }
  0x2c   : > { %vm507_vm0 = vcmask 261120   ;;  %v1081_v0 = vmov 0.0  }
  0x2d   : > { %508 = vst.msk [vmem:[#allocation2] sm:$0xff] %vm507_vm0, %v1081_v0 }
  0x2e PF: > { %v545_v1 = vld [vmem:[%s483_s10 + $0x18] sm:$0xff]  ;;  %v544_v2 = vld [vmem:[%s483_s10 + $0x10] sm:$0xff]  ;;  %v543_v5 = vld [vmem:[%s483_s10 + $0x8] sm:$0xff]  ;;  %vm518_vm1 = vcmask 261120   ;;  %s1388_s23 = scalar_lea.vmem %s1346_s2, %s1215_s21  ;;  %vm599_vm2 = vcmask 64512   ;;  %p897_p1 = scmp.ne.s32.totalorder %s1063_s16, 3 }
  0x2f   : > { %v513_v3 = vld [vmem:[%s475_s18 + $0x18] sm:$0xff]  ;;  %562 = vmatpush.msra.mxu1 %v545_v1  ;;  %v512_v4 = vld [vmem:[%s475_s18 + $0x10] sm:$0xff]  ;;  %v511_v6 = vld [vmem:[%s475_s18 + $0x8] sm:$0xff] }
  0x30   : > { %534 = vmatpush.msra.mxu0 %v513_v3  ;;  %v542_v7 = vld [vmem:[%s483_s10] sm:$0xff]  ;;  %v573_v16 = vld [vmem:[%s1240_s0 + $0x18] sm:$0xff]  ;;  %v572_v17 = vld [vmem:[%s1240_s0 + $0x10] sm:$0xff] }
  0x31   : > { %563 = vmatpush.msra.mxu1 %v544_v2  ;;  %v510_v8 = vld [vmem:[%s475_s18] sm:$0xff]  ;;  %590 = vmatpush.msra.mxu2 %v573_v16  ;;  %v571_v18 = vld [vmem:[%s1240_s0 + $0x8] sm:$0xff] }
  0x32   : > { %535 = vmatpush.msra.mxu0 %v512_v4  ;;  %v509_v9 = vld [vmem:[%s1220_s24] sm:$0xff] }
  0x33   : > { %564 = vmatpush.msra.mxu1 %v543_v5  ;;  %v977_v10 = vld [vmem:[%s486_s14] ss:$0 sm:$0xff]  ;;  %591 = vmatpush.msra.mxu2 %v572_v17 }
  0x34   : > { %536 = vmatpush.msra.mxu0 %v511_v6  ;;  %v978_v11 = vld [vmem:[%s1388_s23] ss:$0 sm:$0xff] }
  0x35   : > { %565 = vmatpush.msra.mxu1 %v542_v7  ;;  %592 = vmatpush.msra.mxu2 %v571_v18  ;;  %v598_v19 = vld [vmem:[%s1250_s26] sm:$0xff] }
  0x36   : > { %537 = vmatpush.msra.mxu0 %v510_v8  ;;  %891 = vmatmul.msk.f32.vlgmr.msra.gmra.mxu1 %vm518_vm1, %v509_v9  ;;  %v570_v23 = vld [vmem:[%s1240_s0] sm:$0xff] }
  0x37   : > { %890 = vmatmul.msk.f32.vlgmr.msra.gmra.mxu0 %vm518_vm1, %v509_v9  ;;  %593 = vmatpush.msra.mxu2 %v570_v23  ;;  %v979_v29 = vld [vmem:[%s494_s30] ss:$0 sm:$0xff] }
  0x38   : > { %892 = vmatmul.msk.f32.vlgmr.msra.gmra.mxu2 %vm518_vm1, %v509_v9  ;;  %v664_v32 = vld [vmem:[%s1255_s25] sm:$0xff] }
  0x39   : > { %683 = vmatpush.msrb.mxu0 %v664_v32  ;;  %v663_v40 = vld [vmem:[#allocation2] sm:$0xff] }
  0xb3   : > { %v567_v12 = vpop.f32.mrf.mxu1 }
  0xb4   : > { %v539_v13 = vpop.f32.mrf.mxu0  ;;  %v568_v14 = vadd.f32 %v977_v10, %v567_v12 }
  0xb5   : > { %v540_v15 = vadd.f32 %v978_v11, %v539_v13 }
  0xb6   : > { %893 = vmatpush.xpose.msk.msra.mxu3 %vm599_vm2, %v568_v14 }
  0xb9   : > { %894 = vmatmul.msk.f32.vlgmr.msra.gmra.mxu3 %vm599_vm2, %v540_v15 }
  0xbb   : > { %v595_v30 = vpop.f32.mrf.mxu2 }
  0xbc   : > { %v596_v31 = vadd.f32 %v979_v29, %v595_v30 }
  0xbe   : > { %658 = vmatpush.msrb.mxu3 %v596_v31 }
 0x13c   : > { %v623_v20 = vpop.f32.mrf.mxu3 }
 0x13d   : > { %v624_v21 = vadd.f32 %v623_v20, %v598_v19 }
 0x13f   : > { %v626_v22 = vsel %vm599_vm2, %v624_v21, -inf }
 0x140   : > { %627 = vmax.xlane.f32.xlu0 %v626_v22 }
 0x1b3   : > { %v628_v24 = vpop.xlane.xlu0 %627 }
 0x1b4   : > { %v629_v25 = vsub.f32 %v624_v21, %v628_v24 }
 0x1b6   : > { %v630_v26 = vmul.f32 1.442695, %v629_v25 }
 0x1b8   : > { %980 = vpow2.f32 %v630_v26 }
 0x1be   : > { %v981_v27 = vpop.eup %980 }
 0x1bf   : > { %v632_v28 = vsel %vm599_vm2, %v981_v27, 0.0 }
 0x1c0   : > { %633 = vadd.xlane.f32.xlu0 %v632_v28 }
 0x233   : > { %v634_v33 = vpop.xlane.xlu0 %633 }
 0x234   : > { %982 = vrcp.f32 %v634_v33 }
 0x23a   : > { %v983_v34 = vpop.eup %982 }
 0x23b   : > { %v636_v35 = vmul.f32 %v983_v34, %v634_v33 }
 0x23d   : > { %v637_v36 = vsub.f32 2.0, %v636_v35 }
 0x23f   : > { %v638_v37 = vmul.f32 %v983_v34, %v637_v36 }
 0x241   : > { %v639_v38 = vmul.f32 %v981_v27, %v638_v37 }
 0x243   : > { %895 = vmatmul.msk.f32.vlgmr.msrb.gmra.mxu3 %vm599_vm2, %v639_v38 }
 0x2c6   : > { %v660_v39 = vpop.f32.mrf.mxu3 }
 0x2c7   : > { %896 = vmatmul.msk.f32.vlgmr.msrb.gmra.mxu0 %vm599_vm2, %v660_v39 }
 0x343   : > { %693 = sbr.rel (%p897_p1) target bundleno = 850 (0x352), region = 68 }
 0x344   : > { %v685_v41 = vpop.f32.mrf.mxu0 }
 0x345   : > { %v688_v42 = vadd.f32 %v685_v41, %v663_v40 }
 0x347   : > { %689 = vst.msk [vmem:[#allocation2] sm:$0xff] %vm518_vm1, %v688_v42 }
 0x348   : > { %v984_v44 = vld [vmem:[%s1352_s8] ss:$0 sm:$0xff] }
 0x34e   : > { %v694_v43 = vld [vmem:[#allocation2] sm:$0xff] }
 0x34f   : > { %v699_v45 = vadd.f32 %v984_v44, %v694_v43 }
 0x351   : > { %700 = vst.msk [vmem:[%s466_s12] sm:$0xff] %vm518_vm1, %v699_v45 }
 0x352 PF: > { %s1389_s21 = sld [smem:[#allocation9_spill]]  ;;  %s714_s13 = sshll.u32 %s466_s12, 4  ;;  %s715_s13 = int_to_ptr.vmem [resolvable:$true] %s714_s13 }
 0x353   : > { %s1390_s22 = sld [smem:[#allocation7_spill]] }
 0x354   : > { %s1392_s16 = sld [smem:[#allocation20_spill]] }
 0x358   : > { %s899_s28 = sshll.u32 %s1389_s21, 3 }
 0x359   : > { %s1394_s25 = sand.u32 1, %s1390_s22  }
 0x35a   : > { %s1393_s29 = smov %s1392_s16  ;;  %s712_s15 = scalar_lea.hbm %s1392_s16, %s899_s28 }
 0x35b   : > { %s716_s20 = sshll.u32 %s712_s15, 4  ;;  %s702_s1 = scalar_lea.sflag [#allocation4], %s1394_s25  ;;  %s717_s20 = int_to_ptr.hbm [resolvable:$true] %s716_s20 }
 0x35c   : > { %s999_s17 = sshra.s32 %s717_s20, 4  ;;  %s1005_s14 = scalar_lea.hbm %s1393_s29, 16  ;;  %s1000_s17 = int_to_ptr.hbm [resolvable:$true] %s999_s17 }
 0x35d   : > { %s1001_s10 = scalar_lea.hbm %s1000_s17, 8  ;;  %p1006_p6 = scmp.lt.s32.totalorder %s1000_s17, %s1393_s29 }
 0x35e   : > { %p1002_p2 = scmp.ne.s32.totalorder %s1000_s17, %s1001_s10  ;;  %p1007_p7 = scmp.lt.s32.totalorder %s1005_s14, %s1001_s10 }
 0x360   : > { %p1003_p4 = pnand %p1002_p2, %p1186_p3  ;;  %p1008_p8 = por %p1007_p7, %p1006_p6 }
 0x362   : > { %p1004_p5 = pneg %p1003_p4 }
 0x364   : > { %p1009_p10 = pnand %p1008_p8, %p1004_p5 }
 0x366   : > { %1012 = shalt.err (!%p1009_p10)
}
 0x367   : > { %905 = dma.vmem_to_hbm [thread:$0]  (%p1186_p3), %s715_s13, 128, %s717_s20, %s702_s1  }
 0x368 PF: > { %s1395_s11 = sld [smem:[#allocation12_spill]] }
 0x369   : > { %s1396_s12 = sld [smem:[#allocation6_spill]] }
 0x36e   : > { %p911_p11 = scmp.ge.s32.totalorder %s1395_s11, 2 }
 0x36f   : > { %s728_s21 = sand.u32 1, %s1396_s12  }
 0x370   : > { %p908_p12 = pnand %p911_p11, %p1196_p9  ;;  %s729_s22 = scalar_lea.sflag [#allocation4], %s728_s21 }
 0x372   : > { %p909_p13 = pneg %p908_p12 }
 0x374   : > { %1046 = dma.done.wait (%p909_p13), %s729_s22, 128  }
 0x375   : > { %1048 = vsyncadd (%p909_p13), %s729_s22, 4294967168  ;;  %s23_s20 = sadd.s32 1, %s1395_s11   ;;  %s1398_s13 = sld [smem:[#allocation7_spill]] }
 0x376   : > { %p20_p0 = scmp.ge.s32.totalorder %s23_s20, 10   ;;  %s1399_s14 = sld [smem:[#allocation8_spill]] }
 0x377   : > { %s1400_s15 = sld [smem:[#allocation17_spill]] }
 0x378   : > { %s1401_s16 = sld [smem:[#allocation10_spill]]  ;;  %22 = sbr.rel (!%p20_p0) target bundleno = 9 (0x9), region = 127 }
 0x379   : > { %s1402_s17 = sld [smem:[#allocation11_spill]] }
 0x37a   : > { %s1403_s18 = sld [smem:[#allocation13_spill]] }
 0x37b   : > { %s1404_s19 = sld [smem:[#allocation15_spill]] }
 0x37d   :  { %735 = vsyncpa [#allocation4], 1 }
 0x37e   :  { %737 = vsyncpa [#allocation4 + $0x1], 1 }

</bundles_post_ra>
